<compile_context>
chip_gen: v6e
topology: v6e:2x2x1
jax: 0.10.0
libtpu: 0.0.40
codegen_flags: <defaults>
</compile_context>

<pallas_src>
import jax
import jax.numpy as jnp
from jax.experimental import pallas as pl
from jax.experimental.pallas import tpu as pltpu


# Packed lane-dense output rows:
#   0-2 rgb_pr | 3-5 diffuse_light | 6-8 albedo | 9 loss_rgb | 10 loss_diffuse_light
PACKED_C = 11


# -------------------- Pallas kernel --------------------
def nero_shade_loss_kernel(
    x_ref,        # (TILE, F)  per-ray features [pts|view_dirs|normals|human_poses]
    rgb_gt_ref,   # (TILE, 3)
    w1_ref,       # (H, F)     VMEM-resident
    b1_ref,       # (H, 1)     VMEM-resident
    w2_ref,       # (9, H)     VMEM-resident (trimmed to consumed rows)
    b2_ref,       # (9, 1)     VMEM-resident
    out_ref,      # (11, TILE) packed lane-dense output
):
    x = x_ref[...]                                                   # (TILE, F)

    # --- shader MLP (stand-in for MCShadingNetwork) ---
    # Contract the feature axis of the row-major ray block against (H, F)
    # weights (trans-b matmul) -> lane-dense (H, TILE), no HBM-side transpose.
    h = jax.lax.dot_general(
        w1_ref[...], x, dimension_numbers=(((1,), (1,)), ((), ())),
        preferred_element_type=jnp.float32) + b1_ref[...]            # (H, TILE)
    h = jnp.maximum(h, 0.0)                                          # ReLU (VPU)
    logits = jnp.dot(w2_ref[...], h,
                     preferred_element_type=jnp.float32) + b2_ref[...]  # (9, TILE)

    sig = jax.nn.sigmoid(logits)   # rows: 0-2 rgb_pr, 3-5 diffuse_light, 6-8 albedo
    rgb_pr = sig[0:3, :]
    diffuse_light = sig[3:6, :]

    # rgb_gt (TILE, 3) -> (3, TILE) via a tiny identity matmul on the MXU
    # (avoids an unaligned in-VMEM vector transpose).
    rows = jax.lax.broadcasted_iota(jnp.int32, (3, 3), 0)
    cols = jax.lax.broadcasted_iota(jnp.int32, (3, 3), 1)
    eye3 = (rows == cols).astype(jnp.float32)
    rgb_gt = jax.lax.dot_general(
        eye3, rgb_gt_ref[...], dimension_numbers=(((1,), (1,)), ((), ())),
        preferred_element_type=jnp.float32)                          # (3, TILE)

    # --- compute_rgb_loss, cfg['rgb_loss'] == 'charbonier' ---
    diff = rgb_gt - rgb_pr
    loss_rgb = jnp.sqrt(jnp.sum(diff * diff, axis=0, keepdims=True) + 0.001)

    # --- compute_diffuse_light_regularization, lambda = 0.1 ---
    dl_mean = jnp.mean(diffuse_light, axis=0, keepdims=True)
    loss_dl = jnp.sum(jnp.abs(diffuse_light - dl_mean), axis=0, keepdims=True) * 0.1

    # Direct slice stores: no concatenate temp, no zero-fill; whole lane-dense
    # (11, TILE) block is covered -> single unmasked writeback per step.
    out_ref[0:9, :] = sig
    out_ref[9:10, :] = loss_rgb
    out_ref[10:11, :] = loss_dl


# -------------------- wrapper --------------------
def nero_train_step(features, rgb_gt, w1, b1, w2, b2, *, tile=None):
    """features: (N, F) f32; rgb_gt: (N, 3) f32; w1 (F, H); b1 (1, H); w2 (H, OUT>=9); b2 (1, OUT)."""
    n, f = features.shape
    assert w2.shape[1] >= 9  # rgb_pr | diffuse_light | albedo

    if tile is None:
        # One grid step covering every ray: this kernel is step-overhead bound,
        # not compute bound.  (Per-step double-buffered footprint is tiny, so
        # prefer growing the tile over growing the grid.)
        tile = max(128, -(-n // 128) * 128)
    n_pad = -(-n // tile) * tile
    if n_pad != n:  # skipped for aligned ray counts (e.g. train_ray_num = 512)
        features = jnp.pad(features, ((0, n_pad - n), (0, 0)))
        rgb_gt = jnp.pad(rgb_gt, ((0, n_pad - n), (0, 0)))

    # Tiny one-time weight prep (fuses under jit); second matmul trimmed to the
    # 9 consumed output channels.
    w1_t = w1.T                     # (H, F)
    b1_t = b1.T                     # (H, 1)
    w2_t = w2[:, :9].T              # (9, H)
    b2_t = b2[:, :9].T              # (9, 1)

    vmem_resident = pl.BlockSpec(memory_space=pltpu.MemorySpace.VMEM)

    packed = pl.pallas_call(
        nero_shade_loss_kernel,
        out_shape=jax.ShapeDtypeStruct((PACKED_C, n_pad), jnp.float32),
        grid_spec=pltpu.PrefetchScalarGridSpec(
            num_scalar_prefetch=0,
            grid=(n_pad // tile,),
            in_specs=[
                pl.BlockSpec((tile, f), lambda i: (i, 0)),   # features, row-major
                pl.BlockSpec((tile, 3), lambda i: (i, 0)),   # rgb_gt, row-major
                vmem_resident,                               # w1 (whole array)
                vmem_resident,                               # b1
                vmem_resident,                               # w2
                vmem_resident,                               # b2
            ],
            out_specs=pl.BlockSpec((PACKED_C, tile), lambda i: (0, i)),
        ),
        compiler_params=pltpu.CompilerParams(
            dimension_semantics=("arbitrary",)),
    )(features, rgb_gt, w1_t, b1_t, w2_t, b2_t)

    # One transpose of the packed slab, then cheap slices (fused under jit).
    out_t = packed[:, :n].T                 # (N, 11)
    rgb_pr = out_t[:, 0:3]
    diffuse_light = out_t[:, 3:6]
    albedo = out_t[:, 6:9]
    loss_rgb = out_t[:, 9:10]
    loss_dl = out_t[:, 10:11]
    return rgb_pr, diffuse_light, albedo, loss_rgb, loss_dl


# -------------------- plain-JAX reference for verification --------------------
def reference(features, rgb_gt, w1, b1, w2, b2):
    h = jnp.maximum(features @ w1 + b1, 0.0)
    out = h @ w2 + b2
    rgb_pr = jax.nn.sigmoid(out[:, 0:3])
    dl = jax.nn.sigmoid(out[:, 3:6])
    albedo = jax.nn.sigmoid(out[:, 6:9])
    loss_rgb = jnp.sqrt(jnp.sum((rgb_gt - rgb_pr) ** 2, -1, keepdims=True) + 0.001)
    loss_dl = jnp.sum(jnp.abs(dl - jnp.mean(dl, -1, keepdims=True)),
                      -1, keepdims=True) * 0.1
    return rgb_pr, dl, albedo, loss_rgb, loss_dl


if __name__ == "__main__":
    key = jax.random.PRNGKey(0)
    k_pts, k_dir, k_nrm, k_pose, k_rgb, k_w1, k_b1, k_w2, k_b2 = jax.random.split(key, 9)

    RN = 512          # cfg['train_ray_num'] default
    HIDDEN = 32
    OUT = 16          # first 9 channels consumed: rgb_pr | diffuse_light | albedo

    # synthetic per-ray inputs (these would come from the ray batch)
    pts = jax.random.normal(k_pts, (RN, 3), jnp.float32)
    rays_d = jax.random.normal(k_dir, (RN, 3), jnp.float32)
    view_dirs = -rays_d / jnp.linalg.norm(rays_d, axis=-1, keepdims=True)
    normals = jax.random.normal(k_nrm, (RN, 3), jnp.float32)
    normals = normals / jnp.linalg.norm(normals, axis=-1, keepdims=True)
    human_poses = jax.random.normal(k_pose, (RN, 3, 4), jnp.float32)
    rgb_gt = jax.random.uniform(k_rgb, (RN, 3), jnp.float32)

    # feature packing (glue in plain JAX): [pts | view_dirs | normals | human_poses]
    features = jnp.concatenate(
        [pts, view_dirs, normals, human_poses.reshape(RN, 12)], axis=-1)  # (RN, 21)
    F_DIM = features.shape[-1]

    # deterministic synthetic shader weights
    w1 = jax.random.normal(k_w1, (F_DIM, HIDDEN), jnp.float32) * 0.2
    b1 = jax.random.normal(k_b1, (1, HIDDEN), jnp.float32) * 0.01
    w2 = jax.random.normal(k_w2, (HIDDEN, OUT), jnp.float32) * 0.2
    b2 = jax.random.normal(k_b2, (1, OUT), jnp.float32) * 0.01

    # jit the whole wrapper so the (tiny) layout plumbing around the Pallas call
    # fuses into one executable instead of many small XLA launches.
    train_step_fn = jax.jit(nero_train_step)
    outs = jax.block_until_ready(train_step_fn(features, rgb_gt, w1, b1, w2, b2))
    rgb_pr, diffuse_light, albedo, loss_rgb, loss_dl = outs

    # correctness check against plain-JAX reference
    refs = reference(features, rgb_gt, w1, b1, w2, b2)
    for got, want in zip(outs, refs):
        assert got.shape == want.shape, (got.shape, want.shape)
        err = jnp.max(jnp.abs(got - want))
        assert err < 3e-4, err

    print("KERNEL_OK")
</pallas_src>

<mosaic_0001>
module attributes {stable_mosaic.version = 11 : i64} {
  func.func @nero_shade_loss_kernel(%arg0: i32, %arg1: memref<512x21xf32, #tpu.memory_space<vmem>>, %arg2: memref<512x3xf32, #tpu.memory_space<vmem>>, %arg3: memref<32x21xf32, #tpu.memory_space<vmem>>, %arg4: memref<32x1xf32, #tpu.memory_space<vmem>>, %arg5: memref<9x32xf32, #tpu.memory_space<vmem>>, %arg6: memref<9x1xf32, #tpu.memory_space<vmem>>, %arg7: memref<11x512xf32, #tpu.memory_space<vmem>>) attributes {dimension_semantics = [#tpu.dimension_semantics<arbitrary>], iteration_bounds = array<i64: 1>, scalar_prefetch = 0 : i64, scratch_operands = 0 : i64, tpu.core_type = #tpu.core_type<tc>, window_params = [{transform_indices = @transform_0, window_bounds = array<i64: 512, 21>}, {transform_indices = @transform_1, window_bounds = array<i64: 512, 3>}, {pipeline_mode = #tpu.pipeline_mode<synchronous>, transform_indices = @transform_2, window_bounds = array<i64: 32, 21>}, {pipeline_mode = #tpu.pipeline_mode<synchronous>, transform_indices = @transform_3, window_bounds = array<i64: 32, 1>}, {pipeline_mode = #tpu.pipeline_mode<synchronous>, transform_indices = @transform_4, window_bounds = array<i64: 9, 32>}, {pipeline_mode = #tpu.pipeline_mode<synchronous>, transform_indices = @transform_5, window_bounds = array<i64: 9, 1>}, {transform_indices = @transform_6, window_bounds = array<i64: 11, 512>}]} {
    %c0 = arith.constant 0 : index
    %c0_0 = arith.constant 0 : index
    %0 = vector.load %arg1[%c0, %c0_0] : memref<512x21xf32, #tpu.memory_space<vmem>>, vector<512x21xf32>
    %c0_1 = arith.constant 0 : index
    %c0_2 = arith.constant 0 : index
    %1 = vector.load %arg3[%c0_1, %c0_2] : memref<32x21xf32, #tpu.memory_space<vmem>>, vector<32x21xf32>
    %cst = arith.constant dense<0.000000e+00> : vector<32x512xf32>
    %2 = tpu.matmul %1, %0, %cst {dimension_numbers = #tpu.dot_dimension_numbers<[1], [1], [0], [0], [0, 0, 1, 0], [], []>} : vector<32x21xf32>, vector<512x21xf32>, vector<32x512xf32> -> vector<32x512xf32>
    %c0_3 = arith.constant 0 : index
    %c0_4 = arith.constant 0 : index
    %3 = vector.load %arg4[%c0_3, %c0_4] : memref<32x1xf32, #tpu.memory_space<vmem>>, vector<32x1xf32>
    %4 = vector.broadcast %3 : vector<32x1xf32> to vector<32x512xf32>
    %5 = arith.addf %2, %4 : vector<32x512xf32>
    %cst_5 = arith.constant 0.000000e+00 : f32
    %6 = vector.broadcast %cst_5 : f32 to vector<32x512xf32>
    %7 = arith.maximumf %5, %6 : vector<32x512xf32>
    %c0_6 = arith.constant 0 : index
    %c0_7 = arith.constant 0 : index
    %8 = vector.load %arg5[%c0_6, %c0_7] : memref<9x32xf32, #tpu.memory_space<vmem>>, vector<9x32xf32>
    %cst_8 = arith.constant dense<0.000000e+00> : vector<9x512xf32>
    %9 = tpu.matmul %8, %7, %cst_8 {dimension_numbers = #tpu.dot_dimension_numbers<[1], [0], [0], [1], [0, 0, 1, 1], [], []>} : vector<9x32xf32>, vector<32x512xf32>, vector<9x512xf32> -> vector<9x512xf32>
    %c0_9 = arith.constant 0 : index
    %c0_10 = arith.constant 0 : index
    %10 = vector.load %arg6[%c0_9, %c0_10] : memref<9x1xf32, #tpu.memory_space<vmem>>, vector<9x1xf32>
    %11 = vector.broadcast %10 : vector<9x1xf32> to vector<9x512xf32>
    %12 = arith.addf %9, %11 : vector<9x512xf32>
    %13 = arith.negf %12 : vector<9x512xf32>
    %14 = math.exp %13 : vector<9x512xf32>
    %cst_11 = arith.constant 1.000000e+00 : f32
    %15 = vector.broadcast %cst_11 : f32 to vector<9x512xf32>
    %16 = arith.addf %15, %14 : vector<9x512xf32>
    %17 = arith.divf %15, %16 : vector<9x512xf32>
    %18 = vector.extract_strided_slice %17 {offsets = [0, 0], sizes = [3, 512], strides = [1, 1]} : vector<9x512xf32> to vector<3x512xf32>
    %19 = vector.extract_strided_slice %17 {offsets = [3, 0], sizes = [3, 512], strides = [1, 1]} : vector<9x512xf32> to vector<3x512xf32>
    %20 = tpu.iota {dimensions = array<i32: 0>} : vector<3x3xi32>
    %21 = tpu.iota {dimensions = array<i32: 1>} : vector<3x3xi32>
    %22 = arith.cmpi eq, %20, %21 : vector<3x3xi32>
    %23 = arith.extui %22 : vector<3x3xi1> to vector<3x3xi32>
    %24 = arith.sitofp %23 : vector<3x3xi32> to vector<3x3xf32>
    %c0_12 = arith.constant 0 : index
    %c0_13 = arith.constant 0 : index
    %25 = vector.load %arg2[%c0_12, %c0_13] : memref<512x3xf32, #tpu.memory_space<vmem>>, vector<512x3xf32>
    %cst_14 = arith.constant dense<0.000000e+00> : vector<3x512xf32>
    %26 = tpu.matmul %24, %25, %cst_14 {dimension_numbers = #tpu.dot_dimension_numbers<[1], [1], [0], [0], [0, 0, 1, 0], [], []>} : vector<3x3xf32>, vector<512x3xf32>, vector<3x512xf32> -> vector<3x512xf32>
    %27 = arith.subf %26, %18 : vector<3x512xf32>
    %28 = arith.mulf %27, %27 : vector<3x512xf32>
    %cst_15 = arith.constant dense<0.000000e+00> : vector<512xf32>
    %29 = vector.multi_reduction <add>, %28, %cst_15 [0] : vector<3x512xf32> to vector<512xf32>
    %30 = vector.shape_cast %29 : vector<512xf32> to vector<1x512xf32>
    %cst_16 = arith.constant 1.000000e-03 : f32
    %31 = vector.broadcast %cst_16 : f32 to vector<1x512xf32>
    %32 = arith.addf %30, %31 : vector<1x512xf32>
    %33 = math.sqrt %32 : vector<1x512xf32>
    %cst_17 = arith.constant dense<0.000000e+00> : vector<512xf32>
    %34 = vector.multi_reduction <add>, %19, %cst_17 [0] : vector<3x512xf32> to vector<512xf32>
    %35 = vector.shape_cast %34 : vector<512xf32> to vector<1x512xf32>
    %cst_18 = arith.constant 3.000000e+00 : f32
    %36 = vector.broadcast %cst_18 : f32 to vector<1x512xf32>
    %37 = arith.divf %35, %36 : vector<1x512xf32>
    %38 = vector.broadcast %37 : vector<1x512xf32> to vector<3x512xf32>
    %39 = arith.subf %19, %38 : vector<3x512xf32>
    %40 = math.absf %39 : vector<3x512xf32>
    %cst_19 = arith.constant dense<0.000000e+00> : vector<512xf32>
    %41 = vector.multi_reduction <add>, %40, %cst_19 [0] : vector<3x512xf32> to vector<512xf32>
    %42 = vector.shape_cast %41 : vector<512xf32> to vector<1x512xf32>
    %cst_20 = arith.constant 1.000000e-01 : f32
    %43 = vector.broadcast %cst_20 : f32 to vector<1x512xf32>
    %44 = arith.mulf %42, %43 : vector<1x512xf32>
    %c0_21 = arith.constant 0 : index
    %c0_22 = arith.constant 0 : index
    %45 = vector.load %arg7[%c0_21, %c0_22] : memref<11x512xf32, #tpu.memory_space<vmem>>, vector<9x512xf32>
    tpu.vector_store %arg7[%c0_21, %c0_22], %17 {strides = array<i32>} : memref<11x512xf32, #tpu.memory_space<vmem>>, vector<9x512xf32>,
    %c9 = arith.constant 9 : index
    %c0_23 = arith.constant 0 : index
    %46 = vector.load %arg7[%c9, %c0_23] : memref<11x512xf32, #tpu.memory_space<vmem>>, vector<1x512xf32>
    tpu.vector_store %arg7[%c9, %c0_23], %33 {strides = array<i32>} : memref<11x512xf32, #tpu.memory_space<vmem>>, vector<1x512xf32>,
    %c10 = arith.constant 10 : index
    %c0_24 = arith.constant 0 : index
    %47 = vector.load %arg7[%c10, %c0_24] : memref<11x512xf32, #tpu.memory_space<vmem>>, vector<1x512xf32>
    tpu.vector_store %arg7[%c10, %c0_24], %44 {strides = array<i32>} : memref<11x512xf32, #tpu.memory_space<vmem>>, vector<1x512xf32>,
    return
  }
  func.func @transform_0(%arg0: i32) -> (i32, i32) {
    %c0_i32 = arith.constant 0 : i32
    %c0_i32_0 = arith.constant 0 : i32
    return %arg0, %c0_i32 : i32, i32
  }
  func.func @transform_1(%arg0: i32) -> (i32, i32) {
    %c0_i32 = arith.constant 0 : i32
    %c0_i32_0 = arith.constant 0 : i32
    return %arg0, %c0_i32 : i32, i32
  }
  func.func @transform_2(%arg0: i32) -> (i32, i32) {
    %c0_i32 = arith.constant 0 : i32
    %c0_i32_0 = arith.constant 0 : i32
    %c0_i32_1 = arith.constant 0 : i32
    return %c0_i32, %c0_i32_0 : i32, i32
  }
  func.func @transform_3(%arg0: i32) -> (i32, i32) {
    %c0_i32 = arith.constant 0 : i32
    %c0_i32_0 = arith.constant 0 : i32
    %c0_i32_1 = arith.constant 0 : i32
    return %c0_i32, %c0_i32_0 : i32, i32
  }
  func.func @transform_4(%arg0: i32) -> (i32, i32) {
    %c0_i32 = arith.constant 0 : i32
    %c0_i32_0 = arith.constant 0 : i32
    %c0_i32_1 = arith.constant 0 : i32
    return %c0_i32, %c0_i32_0 : i32, i32
  }
  func.func @transform_5(%arg0: i32) -> (i32, i32) {
    %c0_i32 = arith.constant 0 : i32
    %c0_i32_0 = arith.constant 0 : i32
    %c0_i32_1 = arith.constant 0 : i32
    return %c0_i32, %c0_i32_0 : i32, i32
  }
  func.func @transform_6(%arg0: i32) -> (i32, i32) {
    %c0_i32 = arith.constant 0 : i32
    %c0_i32_0 = arith.constant 0 : i32
    return %c0_i32, %arg0 : i32, i32
  }
}

</mosaic_0001>

<bundles_post_ra>
// kernel: nero_train_step.1
= control target key start
LH: loop header
LB: loop body
LE: loop exit
PB: predicated region body
PF: predicated region fallthrough
CT: control target
= control target key end

     0   :  { %vm115_vm0 = vcmask 171008   ;;  %v1738_v3 = vmov 0   ;;  %vm528_vm1 = vcmask 261120   ;;  %vm808_vm2 = vcmask 23552   ;;  %s2455_s0 = inlined_call_operand.vmem [shape: f32[512,21], index: 0, kind: input, shape index: {}]   ;;  %s2456_s2 = inlined_call_operand.vmem [shape: f32[32,21], index: 2, kind: input, shape index: {}]   ;;  %s2457_s3 = inlined_call_operand.vmem [shape: f32[32,1], index: 3, kind: input, shape index: {}]   ;;  %s2458_s5 = inlined_call_operand.vmem [shape: f32[9,1], index: 5, kind: input, shape index: {}]   ;;  %s2459_s4 = inlined_call_operand.vmem [shape: f32[9,32], index: 4, kind: input, shape index: {}]   ;;  %s2460_s1 = inlined_call_operand.vmem [shape: f32[512,3], index: 1, kind: input, shape index: {}]   ;;  %s2461_s6 = inlined_call_operand.vmem [shape: f32[11,512], index: 6, kind: output, shape index: {}]  }
   0x1   :  { %v54_v0 = vld [vmem:[%s2455_s0 + $0xf8] sm:$0xff]  ;;  %1697 = vset.pattern.permute.xlu1 %v1738_v3  ;;  %1696 = vset.pattern.permute.xlu0 %v1738_v3  ;;  %v53_v5 = vld [vmem:[%s2455_s0 + $0xf0] sm:$0xff]  ;;  %v52_v9 = vld [vmem:[%s2455_s0 + $0xe8] sm:$0xff]  ;;  %vm1154_vm4 = vcmask 1042432  }
   0x2   :  { %v86_v1 = vld [vmem:[%s2455_s0 + $0x1f8] sm:$0xff]  ;;  %1545 = vmatprep.subr.msk.mxu0 %vm115_vm0, %v54_v0  ;;  %v85_v6 = vld [vmem:[%s2455_s0 + $0x1f0] sm:$0xff]  ;;  %v84_v10 = vld [vmem:[%s2455_s0 + $0x1e8] sm:$0xff] }
   0x3   :  { %v38_v2 = vld [vmem:[%s2455_s0 + $0x78] sm:$0xff]  ;;  %1585 = vmatprep.subr.msk.mxu1 %vm115_vm0, %v86_v1  ;;  %v37_v7 = vld [vmem:[%s2455_s0 + $0x70] sm:$0xff]  ;;  %v36_v11 = vld [vmem:[%s2455_s0 + $0x68] sm:$0xff] }
   0x4   :  { %v70_v4 = vld [vmem:[%s2455_s0 + $0x178] sm:$0xff]  ;;  %1546 = vmatpush3.xpose.msk.msra.mxu0 %vm115_vm0, %v38_v2  ;;  %v69_v8 = vld [vmem:[%s2455_s0 + $0x170] sm:$0xff]  ;;  %v68_v12 = vld [vmem:[%s2455_s0 + $0x168] sm:$0xff] }
   0x5   :  { %1586 = vmatpush3.xpose.msk.msra.mxu1 %vm115_vm0, %v70_v4  ;;  %1547 = vmatprep.subr.msk.mxu0 %vm115_vm0, %v53_v5  ;;  %v51_v13 = vld [vmem:[%s2455_s0 + $0xe0] sm:$0xff]  ;;  %v50_v17 = vld [vmem:[%s2455_s0 + $0xd8] sm:$0xff]  ;;  %v49_v21 = vld [vmem:[%s2455_s0 + $0xd0] sm:$0xff] }
   0x6   :  { %1587 = vmatprep.subr.msk.mxu1 %vm115_vm0, %v85_v6  ;;  %v83_v14 = vld [vmem:[%s2455_s0 + $0x1e0] sm:$0xff]  ;;  %v82_v18 = vld [vmem:[%s2455_s0 + $0x1d8] sm:$0xff]  ;;  %v81_v22 = vld [vmem:[%s2455_s0 + $0x1d0] sm:$0xff] }
   0x7   :  { %v35_v15 = vld [vmem:[%s2455_s0 + $0x60] sm:$0xff]  ;;  %v34_v19 = vld [vmem:[%s2455_s0 + $0x58] sm:$0xff]  ;;  %v33_v23 = vld [vmem:[%s2455_s0 + $0x50] sm:$0xff] }
   0x8   :  { %1548 = vmatpush3.xpose.msk.msra.mxu0 %vm115_vm0, %v37_v7  ;;  %v67_v16 = vld [vmem:[%s2455_s0 + $0x160] sm:$0xff]  ;;  %v66_v20 = vld [vmem:[%s2455_s0 + $0x158] sm:$0xff]  ;;  %v65_v24 = vld [vmem:[%s2455_s0 + $0x150] sm:$0xff] }
   0x9   :  { %1588 = vmatpush3.xpose.msk.msra.mxu1 %vm115_vm0, %v69_v8  ;;  %1549 = vmatprep.subr.msk.mxu0 %vm115_vm0, %v52_v9  ;;  %v48_v25 = vld [vmem:[%s2455_s0 + $0xc8] sm:$0xff]  ;;  %v1879_v27 = vld [vmem:[%s2456_s2] sm:$0xff]  ;;  %v94_v31 = vld [vmem:[%s2457_s3 + $0x18] sm:$0xff] }
   0xa   :  { %1589 = vmatprep.subr.msk.mxu1 %vm115_vm0, %v84_v10  ;;  %v80_v26 = vld [vmem:[%s2455_s0 + $0x1c8] sm:$0xff]  ;;  %v47_v32 = vld [vmem:[%s2455_s0 + $0xc0] sm:$0xff]  ;;  %1577 = vmatprep.mubr.msk.f32.mxu0 %vm115_vm0, %v1879_v27  ;;  %v93_v35 = vld [vmem:[%s2457_s3 + $0x10] sm:$0xff] }
   0xb   :  { %v92_v28 = vld [vmem:[%s2457_s3 + $0x8] sm:$0xff]  ;;  %v79_v33 = vld [vmem:[%s2455_s0 + $0x1c0] sm:$0xff]  ;;  %1617 = vmatprep.mubr.msk.f32.mxu1 %vm115_vm0, %v1879_v27  ;;  %112 = vperm.xlu0 %1696, %v94_v31   ;;  %v46_v38 = vld [vmem:[%s2455_s0 + $0xb8] sm:$0xff] }
   0xc   :  { %1550 = vmatpush3.xpose.msk.msra.mxu0 %vm115_vm0, %v36_v11  ;;  %v32_v29 = vld [vmem:[%s2455_s0 + $0x48] sm:$0xff]  ;;  %102 = vperm.xlu1 %1697, %v92_v28   ;;  %v91_v34 = vld [vmem:[%s2457_s3] sm:$0xff]  ;;  %v78_v39 = vld [vmem:[%s2455_s0 + $0x1b8] sm:$0xff]  ;;  %v1739_v11 = vmov 0.0  }
   0xd   :  { %1590 = vmatpush3.xpose.msk.msra.mxu1 %vm115_vm0, %v68_v12  ;;  %1551 = vmatprep.subr.msk.mxu0 %vm115_vm0, %v51_v13  ;;  %v64_v30 = vld [vmem:[%s2455_s0 + $0x148] sm:$0xff]  ;;  %v31_v36 = vld [vmem:[%s2455_s0 + $0x40] sm:$0xff]  ;;  %v30_v42 = vld [vmem:[%s2455_s0 + $0x38] sm:$0xff] }
   0xe   :  { %1591 = vmatprep.subr.msk.mxu1 %vm115_vm0, %v83_v14  ;;  %v63_v37 = vld [vmem:[%s2455_s0 + $0x140] sm:$0xff]  ;;  %v517_v41 = vld [vmem:[%s2458_s5 + $0x8] sm:$0x1]  ;;  %v62_v43 = vld [vmem:[%s2455_s0 + $0x138] sm:$0xff] }
   0xf   :  { %107 = vperm.xlu0 %1696, %v93_v35   ;;  %v516_v40 = vld [vmem:[%s2458_s5] sm:$0xff]  ;;  %v45_v44 = vld [vmem:[%s2455_s0 + $0xb0] sm:$0xff]  ;;  %v44_v48 = vld [vmem:[%s2455_s0 + $0xa8] sm:$0xff] }
  0x10   :  { %1552 = vmatpush3.xpose.msk.msra.mxu0 %vm115_vm0, %v35_v15  ;;  %97 = vperm.xlu1 %1697, %v91_v34   ;;  %v77_v45 = vld [vmem:[%s2455_s0 + $0x1b0] sm:$0xff]  ;;  %v76_v49 = vld [vmem:[%s2455_s0 + $0x1a8] sm:$0xff]  ;;  %v43_v52 = vld [vmem:[%s2455_s0 + $0xa0] sm:$0xff] }
  0x11   :  { %1592 = vmatpush3.xpose.msk.msra.mxu1 %vm115_vm0, %v67_v16  ;;  %1553 = vmatprep.subr.msk.mxu0 %vm115_vm0, %v50_v17  ;;  %v29_v46 = vld [vmem:[%s2455_s0 + $0x30] sm:$0xff]  ;;  %v28_v50 = vld [vmem:[%s2455_s0 + $0x28] sm:$0xff]  ;;  %v75_v53 = vld [vmem:[%s2455_s0 + $0x1a0] sm:$0xff] }
  0x12   :  { %1593 = vmatprep.subr.msk.mxu1 %vm115_vm0, %v82_v18  ;;  %v61_v47 = vld [vmem:[%s2455_s0 + $0x130] sm:$0xff]  ;;  %v60_v51 = vld [vmem:[%s2455_s0 + $0x128] sm:$0xff]  ;;  %v27_v54 = vld [vmem:[%s2455_s0 + $0x20] sm:$0xff] }
  0x13   :  { %520 = vperm.xlu0 %1696, %v516_v40   ;;  %v59_v55 = vld [vmem:[%s2455_s0 + $0x120] sm:$0xff]  ;;  %v42_v56 = vld [vmem:[%s2455_s0 + $0x98] sm:$0xff]  ;;  %v41_v60 = vld [vmem:[%s2455_s0 + $0x90] sm:$0xff] }
  0x14   :  { %1554 = vmatpush3.xpose.msk.msra.mxu0 %vm115_vm0, %v34_v19  ;;  %525 = vperm.xlu1 %1697, %v517_v41   ;;  %v74_v57 = vld [vmem:[%s2455_s0 + $0x198] sm:$0xff]  ;;  %v73_v61 = vld [vmem:[%s2455_s0 + $0x190] sm:$0xff]  ;;  %v40_v0 = vld [vmem:[%s2455_s0 + $0x88] sm:$0xff] }
  0x15   :  { %1594 = vmatpush3.xpose.msk.msra.mxu1 %vm115_vm0, %v66_v20  ;;  %1555 = vmatprep.subr.msk.mxu0 %vm115_vm0, %v49_v21  ;;  %v26_v58 = vld [vmem:[%s2455_s0 + $0x18] sm:$0xff]  ;;  %v25_v62 = vld [vmem:[%s2455_s0 + $0x10] sm:$0xff]  ;;  %v72_v1 = vld [vmem:[%s2455_s0 + $0x188] sm:$0xff] }
  0x16   :  { %1595 = vmatprep.subr.msk.mxu1 %vm115_vm0, %v81_v22  ;;  %v58_v59 = vld [vmem:[%s2455_s0 + $0x118] sm:$0xff]  ;;  %v57_v63 = vld [vmem:[%s2455_s0 + $0x110] sm:$0xff]  ;;  %v24_v2 = vld [vmem:[%s2455_s0 + $0x8] sm:$0xff] }
  0x17   :  { %v56_v3 = vld [vmem:[%s2455_s0 + $0x108] sm:$0xff]  ;;  %v39_v4 = vld [vmem:[%s2455_s0 + $0x80] sm:$0xff]  ;;  %v89_v9 = vld [vmem:[%s2456_s2 + $0x10] sm:$0xff] }
  0x18   :  { %1556 = vmatpush3.xpose.msk.msra.mxu0 %vm115_vm0, %v33_v23  ;;  %v71_v5 = vld [vmem:[%s2455_s0 + $0x180] sm:$0xff]  ;;  %v88_v8 = vld [vmem:[%s2456_s2 + $0x8] sm:$0xff]  ;;  %v90_v10 = vld [vmem:[%s2456_s2 + $0x18] sm:$0xff] }
  0x19   :  { %1596 = vmatpush3.xpose.msk.msra.mxu1 %vm115_vm0, %v65_v24  ;;  %1557 = vmatprep.subr.msk.mxu0 %vm115_vm0, %v48_v25  ;;  %v23_v6 = vld [vmem:[%s2455_s0] sm:$0xff] }
  0x1a   :  { %1597 = vmatprep.subr.msk.mxu1 %vm115_vm0, %v80_v26  ;;  %v55_v7 = vld [vmem:[%s2455_s0 + $0x100] sm:$0xff] }
  0x1c   :  { %1558 = vmatpush3.xpose.msk.msra.mxu0 %vm115_vm0, %v32_v29 }
  0x1d   :  { %1598 = vmatpush3.xpose.msk.msra.mxu1 %vm115_vm0, %v64_v30  ;;  %1559 = vmatprep.subr.msk.mxu0 %vm115_vm0, %v47_v32 }
  0x1e   :  { %1599 = vmatprep.subr.msk.mxu1 %vm115_vm0, %v79_v33 }
  0x20   :  { %1560 = vmatpush3.xpose.msk.msra.mxu0 %vm115_vm0, %v31_v36 }
  0x21   :  { %1600 = vmatpush3.xpose.msk.msra.mxu1 %vm115_vm0, %v63_v37  ;;  %1561 = vmatprep.subr.msk.mxu0 %vm115_vm0, %v46_v38 }
  0x22   :  { %1601 = vmatprep.subr.msk.mxu1 %vm115_vm0, %v78_v39 }
  0x24   :  { %1562 = vmatpush3.xpose.msk.msra.mxu0 %vm115_vm0, %v30_v42 }
  0x25   :  { %1602 = vmatpush3.xpose.msk.msra.mxu1 %vm115_vm0, %v62_v43  ;;  %1563 = vmatprep.subr.msk.mxu0 %vm115_vm0, %v45_v44 }
  0x26   :  { %1603 = vmatprep.subr.msk.mxu1 %vm115_vm0, %v77_v45 }
  0x28   :  { %1564 = vmatpush3.xpose.msk.msra.mxu0 %vm115_vm0, %v29_v46 }
  0x29   :  { %1604 = vmatpush3.xpose.msk.msra.mxu1 %vm115_vm0, %v61_v47  ;;  %1565 = vmatprep.subr.msk.mxu0 %vm115_vm0, %v44_v48 }
  0x2a   :  { %1605 = vmatprep.subr.msk.mxu1 %vm115_vm0, %v76_v49 }
  0x2c   :  { %1566 = vmatpush3.xpose.msk.msra.mxu0 %vm115_vm0, %v28_v50 }
  0x2d   :  { %1606 = vmatpush3.xpose.msk.msra.mxu1 %vm115_vm0, %v60_v51  ;;  %1567 = vmatprep.subr.msk.mxu0 %vm115_vm0, %v43_v52 }
  0x2e   :  { %1607 = vmatprep.subr.msk.mxu1 %vm115_vm0, %v75_v53 }
  0x30   :  { %1568 = vmatpush3.xpose.msk.msra.mxu0 %vm115_vm0, %v27_v54 }
  0x31   :  { %1608 = vmatpush3.xpose.msk.msra.mxu1 %vm115_vm0, %v59_v55  ;;  %1569 = vmatprep.subr.msk.mxu0 %vm115_vm0, %v42_v56 }
  0x32   :  { %1609 = vmatprep.subr.msk.mxu1 %vm115_vm0, %v74_v57 }
  0x34   :  { %1570 = vmatpush3.xpose.msk.msra.mxu0 %vm115_vm0, %v26_v58  ;;  %v737_v58 = vlaneseq }
  0x35   :  { %1610 = vmatpush3.xpose.msk.msra.mxu1 %vm115_vm0, %v58_v59  ;;  %1571 = vmatprep.subr.msk.mxu0 %vm115_vm0, %v41_v60 }
  0x36   :  { %1611 = vmatprep.subr.msk.mxu1 %vm115_vm0, %v73_v61  ;;  %vm2436_vm5 = vcmp.lt.s32.totalorder %v737_v58, 512 }
  0x38   :  { %1572 = vmatpush3.xpose.msk.msra.mxu0 %vm115_vm0, %v25_v62 }
  0x39   :  { %1612 = vmatpush3.xpose.msk.msra.mxu1 %vm115_vm0, %v57_v63  ;;  %1573 = vmatprep.subr.msk.mxu0 %vm115_vm0, %v40_v0 }
  0x3a   :  { %1613 = vmatprep.subr.msk.mxu1 %vm115_vm0, %v72_v1  ;;  %v514_v1 = vld [vmem:[%s2459_s4] sm:$0xff] }
  0x3c   :  { %1574 = vmatpush3.xpose.msk.msra.mxu0 %vm115_vm0, %v24_v2  ;;  %v775_v2 = vld [vmem:[%s2460_s1 + $0xf8] sm:$0xff] }
  0x3d   :  { %1614 = vmatpush3.xpose.msk.msra.mxu1 %vm115_vm0, %v56_v3  ;;  %1575 = vmatprep.subr.msk.mxu0 %vm115_vm0, %v39_v4  ;;  %v807_v3 = vld [vmem:[%s2460_s1 + $0x1f8] sm:$0xff]  ;;  %v2096_v4 = vshrl.u32 %v737_v58, 7 }
  0x3e   :  { %1615 = vmatprep.subr.msk.mxu1 %vm115_vm0, %v71_v5  ;;  %v740_v5 = vand.u32 127, %v737_v58 }
  0x40   :  { %1576 = vmatpush3.xpose.msk.msra.mxu0 %vm115_vm0, %v23_v6  ;;  %v759_v6 = vld [vmem:[%s2460_s1 + $0x78] sm:$0xff]  ;;  %vm741_vm3 = vcmp.eq.s32.totalorder %v2096_v4, %v740_v5  ;;  %v792_v5 = vld [vmem:[%s2460_s1 + $0x180] sm:$0xff] }
  0x41   :  { %1616 = vmatpush3.xpose.msk.msra.mxu1 %vm115_vm0, %v55_v7  ;;  %v791_v7 = vld [vmem:[%s2460_s1 + $0x178] sm:$0xff] }
  0x43   :  { %1578 = vmatmul.mubr.msk.f32.vlgmr.msra.gmra.mxu0 %vm115_vm0, %v1879_v27 }
  0x44   :  { %1618 = vmatmul.mubr.msk.f32.vlgmr.msra.gmra.mxu1 %vm115_vm0, %v1879_v27  ;;  %1579 = vmatprep.mubr.msk.f32.mxu0 %vm115_vm0, %v88_v8 }
  0x45   :  { %1619 = vmatprep.mubr.msk.f32.mxu1 %vm115_vm0, %v88_v8 }
  0x47   :  { %1580 = vmatmul.mubr.msk.f32.gmra.mxu0 %vm115_vm0, %v88_v8 }
  0x48   :  { %1620 = vmatmul.mubr.msk.f32.gmra.mxu1 %vm115_vm0, %v88_v8  ;;  %1581 = vmatprep.mubr.msk.f32.mxu0 %vm115_vm0, %v89_v9  ;;  %v515_v8 = vld [vmem:[%s2459_s4 + $0x8] sm:$0x1] }
  0x49   :  { %1621 = vmatprep.mubr.msk.f32.mxu1 %vm115_vm0, %v89_v9 }
  0x4b   :  { %1582 = vmatmul.mubr.msk.f32.gmra.mxu0 %vm115_vm0, %v89_v9 }
  0x4c   :  { %1622 = vmatmul.mubr.msk.f32.gmra.mxu1 %vm115_vm0, %v89_v9  ;;  %1583 = vmatprep.mubr.msk.f32.mxu0 %vm115_vm0, %v90_v10  ;;  %v774_v9 = vld [vmem:[%s2460_s1 + $0xf0] sm:$0xff] }
  0x4d   :  { %1623 = vmatprep.mubr.msk.f32.mxu1 %vm115_vm0, %v90_v10 }
  0x4f   :  { %1584 = vmatmul.mubr.msk.f32.gmra.mxu0 %vm115_vm0, %v90_v10 }
  0x50   :  { %1624 = vmatmul.mubr.msk.f32.gmra.mxu1 %vm115_vm0, %v90_v10  ;;  %599 = vmatprep.mubr.f32.mxu0 %v1739_v11  ;;  %v806_v10 = vld [vmem:[%s2460_s1 + $0x1f0] sm:$0xff] }
  0x51   :  { %676 = vmatprep.mubr.f32.mxu1 %v1739_v11 }
  0x86   :  { %v113_v20 = vpop.permute.xlu0 %112 }
  0x87   :  { %v103_v25 = vpop.permute.xlu1 %102 }
  0x8a   :  { %v108_v28 = vpop.permute.xlu0 %107 }
  0x8b   :  { %v98_v39 = vpop.permute.xlu1 %97 }
 0x103   :  { %v386_v12 = vpop.f32.mrf.mxu0 }
 0x104   :  { %v475_v13 = vpop.f32.mrf.mxu1  ;;  %v387_v52 = vadd.f32 %v386_v12, %v98_v39  ;;  %v758_v12 = vld [vmem:[%s2460_s1 + $0x70] sm:$0xff] }
 0x105   :  { %v388_v14 = vpop.f32.mrf.mxu0  ;;  %v476_v53 = vadd.f32 %v475_v13, %v98_v39  ;;  %v790_v13 = vld [vmem:[%s2460_s1 + $0x170] sm:$0xff] }
 0x106   :  { %v477_v15 = vpop.f32.mrf.mxu1  ;;  %v389_v48 = vadd.f32 %v388_v14, %v98_v39  ;;  %v498_v63 = vmax.f32 %v387_v52, 0.0  ;;  %v773_v14 = vld [vmem:[%s2460_s1 + $0xe8] sm:$0xff]  ;;  %v748_v52 = vld [vmem:[%s2460_s1 + $0x20] sm:$0xff] }
 0x107   :  { %v392_v16 = vpop.f32.mrf.mxu0  ;;  %v478_v49 = vadd.f32 %v477_v15, %v98_v39  ;;  %v500_v0 = vmax.f32 %v476_v53, 0.0  ;;  %v805_v15 = vld [vmem:[%s2460_s1 + $0x1e8] sm:$0xff]  ;;  %v799_v39 = vld [vmem:[%s2460_s1 + $0x1b8] sm:$0xff]  ;;  %v780_v53 = vld [vmem:[%s2460_s1 + $0x120] sm:$0xff] }
 0x108   :  { %v481_v17 = vpop.f32.mrf.mxu1  ;;  %v393_v44 = vadd.f32 %v392_v16, %v103_v25  ;;  %v499_v61 = vmax.f32 %v389_v48, 0.0  ;;  %v2140_v16 = vsel %vm741_vm3, 1.0, %v1739_v11  ;;  %v749_v48 = vld [vmem:[%s2460_s1 + $0x28] sm:$0xff] }
 0x109   :  { %v394_v18 = vpop.f32.mrf.mxu0  ;;  %v482_v45 = vadd.f32 %v481_v17, %v103_v25  ;;  %v501_v62 = vmax.f32 %v478_v49, 0.0  ;;  %v757_v17 = vld [vmem:[%s2460_s1 + $0x68] sm:$0xff] }
 0x10a   :  { %v483_v19 = vpop.f32.mrf.mxu1  ;;  %v395_v40 = vadd.f32 %v394_v18, %v103_v25  ;;  %v502_v59 = vmax.f32 %v393_v44, 0.0  ;;  %v789_v18 = vld [vmem:[%s2460_s1 + $0x168] sm:$0xff]  ;;  %v750_v44 = vld [vmem:[%s2460_s1 + $0x30] sm:$0xff] }
 0x10b   :  { %v398_v21 = vpop.f32.mrf.mxu0  ;;  %v484_v41 = vadd.f32 %v483_v19, %v103_v25  ;;  %v504_v60 = vmax.f32 %v482_v45, 0.0  ;;  %v804_v19 = vld [vmem:[%s2460_s1 + $0x1e0] sm:$0xff]  ;;  %v787_v25 = vld [vmem:[%s2460_s1 + $0x158] sm:$0xff]  ;;  %v782_v45 = vld [vmem:[%s2460_s1 + $0x130] sm:$0xff] }
 0x10c   :  { %v487_v22 = vpop.f32.mrf.mxu1  ;;  %v399_v37 = vadd.f32 %v398_v21, %v108_v28  ;;  %v503_v56 = vmax.f32 %v395_v40, 0.0  ;;  %v788_v21 = vld [vmem:[%s2460_s1 + $0x160] sm:$0xff]  ;;  %v751_v40 = vld [vmem:[%s2460_s1 + $0x38] sm:$0xff]  ;;  %v781_v49 = vld [vmem:[%s2460_s1 + $0x128] sm:$0xff] }
 0x10d   :  { %v400_v23 = vpop.f32.mrf.mxu0  ;;  %v488_v38 = vadd.f32 %v487_v22, %v108_v28  ;;  %v505_v57 = vmax.f32 %v484_v41, 0.0  ;;  %v771_v22 = vld [vmem:[%s2460_s1 + $0xd8] sm:$0xff] }
 0x10e   :  { %v489_v24 = vpop.f32.mrf.mxu1  ;;  %v401_v33 = vadd.f32 %v400_v23, %v108_v28  ;;  %v506_v54 = vmax.f32 %v399_v37, 0.0  ;;  %v803_v23 = vld [vmem:[%s2460_s1 + $0x1d8] sm:$0xff]  ;;  %v784_v37 = vld [vmem:[%s2460_s1 + $0x140] sm:$0xff] }
 0x10f   :  { %v404_v26 = vpop.f32.mrf.mxu0  ;;  %v490_v34 = vadd.f32 %v489_v24, %v108_v28  ;;  %v508_v55 = vmax.f32 %v488_v38, 0.0  ;;  %v755_v24 = vld [vmem:[%s2460_s1 + $0x58] sm:$0xff]  ;;  %v754_v28 = vld [vmem:[%s2460_s1 + $0x50] sm:$0xff] }
 0x110   :  { %v493_v27 = vpop.f32.mrf.mxu1  ;;  %v405_v29 = vadd.f32 %v404_v26, %v113_v20  ;;  %v507_v50 = vmax.f32 %v401_v33, 0.0  ;;  %v770_v26 = vld [vmem:[%s2460_s1 + $0xd0] sm:$0xff]  ;;  %v785_v33 = vld [vmem:[%s2460_s1 + $0x148] sm:$0xff]  ;;  %v767_v38 = vld [vmem:[%s2460_s1 + $0xb8] sm:$0xff] }
 0x111   :  { %v494_v30 = vadd.f32 %v493_v27, %v113_v20  ;;  %v406_v31 = vpop.f32.mrf.mxu0  ;;  %v509_v51 = vmax.f32 %v490_v34, 0.0  ;;  %v802_v27 = vld [vmem:[%s2460_s1 + $0x1d0] sm:$0xff]  ;;  %v768_v34 = vld [vmem:[%s2460_s1 + $0xc0] sm:$0xff]  ;;  %v783_v41 = vld [vmem:[%s2460_s1 + $0x138] sm:$0xff] }
 0x112   :  { %v495_v32 = vpop.f32.mrf.mxu1  ;;  %v407_v35 = vadd.f32 %v406_v31, %v113_v20  ;;  %v510_v46 = vmax.f32 %v405_v29, 0.0  ;;  %v786_v29 = vld [vmem:[%s2460_s1 + $0x150] sm:$0xff]  ;;  %v801_v31 = vld [vmem:[%s2460_s1 + $0x1c8] sm:$0xff] }
 0x113   :  { %v496_v36 = vadd.f32 %v495_v32, %v113_v20  ;;  %v512_v47 = vmax.f32 %v494_v30, 0.0  ;;  %v756_v20 = vld [vmem:[%s2460_s1 + $0x60] sm:$0xff]  ;;  %v769_v30 = vld [vmem:[%s2460_s1 + $0xc8] sm:$0xff] }
 0x114   :  { %v511_v42 = vmax.f32 %v407_v35, 0.0  ;;  %v753_v32 = vld [vmem:[%s2460_s1 + $0x48] sm:$0xff]  ;;  %v800_v35 = vld [vmem:[%s2460_s1 + $0x1c0] sm:$0xff] }
 0x115   :  { %v513_v43 = vmax.f32 %v496_v36, 0.0  ;;  %v752_v36 = vld [vmem:[%s2460_s1 + $0x40] sm:$0xff] }
 0x116   :  { %559 = vmatprep.subr.mxu0 %v511_v42  ;;  %v766_v42 = vld [vmem:[%s2460_s1 + $0xb0] sm:$0xff] }
 0x117   :  { %636 = vmatprep.subr.mxu1 %v513_v43  ;;  %560 = vmatpush1.msra.mxu0 %v510_v46  ;;  %v798_v43 = vld [vmem:[%s2460_s1 + $0x1b0] sm:$0xff]  ;;  %v765_v46 = vld [vmem:[%s2460_s1 + $0xa8] sm:$0xff] }
 0x118   :  { %637 = vmatpush1.msra.mxu1 %v512_v47  ;;  %561 = vmatprep.subr.mxu0 %v507_v50  ;;  %v797_v47 = vld [vmem:[%s2460_s1 + $0x1a8] sm:$0xff]  ;;  %v764_v50 = vld [vmem:[%s2460_s1 + $0xa0] sm:$0xff] }
 0x119   :  { %638 = vmatprep.subr.mxu1 %v509_v51  ;;  %562 = vmatpush1.msra.mxu0 %v506_v54  ;;  %v796_v51 = vld [vmem:[%s2460_s1 + $0x1a0] sm:$0xff]  ;;  %v763_v54 = vld [vmem:[%s2460_s1 + $0x98] sm:$0xff] }
 0x11a   :  { %639 = vmatpush1.msra.mxu1 %v508_v55  ;;  %563 = vmatprep.subr.mxu0 %v503_v56  ;;  %v795_v55 = vld [vmem:[%s2460_s1 + $0x198] sm:$0xff] }
 0x11b   :  { %640 = vmatprep.subr.mxu1 %v505_v57  ;;  %564 = vmatpush1.msra.mxu0 %v502_v59  ;;  %v747_v56 = vld [vmem:[%s2460_s1 + $0x18] sm:$0xff]  ;;  %v762_v59 = vld [vmem:[%s2460_s1 + $0x90] sm:$0xff] }
 0x11c   :  { %641 = vmatpush1.msra.mxu1 %v504_v60  ;;  %565 = vmatprep.subr.mxu0 %v499_v61  ;;  %v779_v57 = vld [vmem:[%s2460_s1 + $0x118] sm:$0xff]  ;;  %v794_v60 = vld [vmem:[%s2460_s1 + $0x190] sm:$0xff] }
 0x11d   :  { %642 = vmatprep.subr.mxu1 %v501_v62  ;;  %566 = vmatpush1.msra.mxu0 %v498_v63  ;;  %v746_v61 = vld [vmem:[%s2460_s1 + $0x10] sm:$0xff]  ;;  %v761_v63 = vld [vmem:[%s2460_s1 + $0x88] sm:$0xff] }
 0x11e   :  { %643 = vmatpush1.msra.mxu1 %v500_v0  ;;  %1464 = vmatmul.mubr.msk.f32.vlgmr.msra.gmra.mxu0 %vm528_vm1, %v514_v1  ;;  %v778_v62 = vld [vmem:[%s2460_s1 + $0x110] sm:$0xff]  ;;  %v793_v0 = vld [vmem:[%s2460_s1 + $0x188] sm:$0xff] }
 0x11f   :  { %1466 = vmatmul.mubr.msk.f32.vlgmr.msra.gmra.mxu1 %vm528_vm1, %v514_v1  ;;  %1625 = vmatprep.subr.msk.mxu0 %vm808_vm2, %v775_v2  ;;  %v745_v1 = vld [vmem:[%s2460_s1 + $0x8] sm:$0xff] }
 0x120   :  { %1659 = vmatprep.subr.msk.mxu1 %vm808_vm2, %v807_v3  ;;  %1626 = vmatpush3.xpose.msk.msra.mxu0 %vm808_vm2, %v759_v6  ;;  %v777_v2 = vld [vmem:[%s2460_s1 + $0x108] sm:$0xff]  ;;  %v760_v3 = vld [vmem:[%s2460_s1 + $0x80] sm:$0xff] }
 0x121   :  { %1660 = vmatpush3.xpose.msk.msra.mxu1 %vm808_vm2, %v791_v7  ;;  %605 = vmatprep.mubr.f32.mxu0 %v1739_v11  ;;  %v744_v6 = vld [vmem:[%s2460_s1] sm:$0xff] }
 0x122   :  { %682 = vmatprep.mubr.f32.mxu1 %v1739_v11  ;;  %1465 = vmatmul.mubr.msk.f32.gmra.mxu0 %vm528_vm1, %v515_v8  ;;  %v772_v11 = vld [vmem:[%s2460_s1 + $0xe0] sm:$0xff] }
 0x123   :  { %1467 = vmatmul.mubr.msk.f32.gmra.mxu1 %vm528_vm1, %v515_v8  ;;  %1627 = vmatprep.subr.msk.mxu0 %vm808_vm2, %v774_v9  ;;  %v776_v7 = vld [vmem:[%s2460_s1 + $0x100] sm:$0xff]  ;;  %v521_v8 = vpop.permute.xlu0 %520 }
 0x124   :  { %1661 = vmatprep.subr.msk.mxu1 %vm808_vm2, %v806_v10  ;;  %1628 = vmatpush3.xpose.msk.msra.mxu0 %vm808_vm2, %v758_v12 }
 0x125   :  { %1662 = vmatpush3.xpose.msk.msra.mxu1 %vm808_vm2, %v790_v13  ;;  %1629 = vmatprep.subr.msk.mxu0 %vm808_vm2, %v773_v14 }
 0x126   :  { %1663 = vmatprep.subr.msk.mxu1 %vm808_vm2, %v805_v15  ;;  %1657 = vmatprep.mubr.msk.f32.mxu0 %vm808_vm2, %v2140_v16 }
 0x127   :  { %1691 = vmatprep.mubr.msk.f32.mxu1 %vm808_vm2, %v2140_v16 }
 0x128   :  { %1630 = vmatpush3.xpose.msk.msra.mxu0 %vm808_vm2, %v757_v17  ;;  %v526_v17 = vpop.permute.xlu1 %525 }
 0x129   :  { %1664 = vmatpush3.xpose.msk.msra.mxu1 %vm808_vm2, %v789_v18  ;;  %1631 = vmatprep.subr.msk.mxu0 %vm808_vm2, %v772_v11 }
 0x12a   :  { %1665 = vmatprep.subr.msk.mxu1 %vm808_vm2, %v804_v19 }
 0x12c   :  { %1632 = vmatpush3.xpose.msk.msra.mxu0 %vm808_vm2, %v756_v20 }
 0x12d   :  { %1666 = vmatpush3.xpose.msk.msra.mxu1 %vm808_vm2, %v788_v21  ;;  %1633 = vmatprep.subr.msk.mxu0 %vm808_vm2, %v771_v22 }
 0x12e   :  { %1667 = vmatprep.subr.msk.mxu1 %vm808_vm2, %v803_v23 }
 0x130   :  { %1634 = vmatpush3.xpose.msk.msra.mxu0 %vm808_vm2, %v755_v24 }
 0x131   :  { %1668 = vmatpush3.xpose.msk.msra.mxu1 %vm808_vm2, %v787_v25  ;;  %1635 = vmatprep.subr.msk.mxu0 %vm808_vm2, %v770_v26 }
 0x132   :  { %1669 = vmatprep.subr.msk.mxu1 %vm808_vm2, %v802_v27 }
 0x134   :  { %1636 = vmatpush3.xpose.msk.msra.mxu0 %vm808_vm2, %v754_v28 }
 0x135   :  { %1670 = vmatpush3.xpose.msk.msra.mxu1 %vm808_vm2, %v786_v29  ;;  %1637 = vmatprep.subr.msk.mxu0 %vm808_vm2, %v769_v30 }
 0x136   :  { %1671 = vmatprep.subr.msk.mxu1 %vm808_vm2, %v801_v31 }
 0x138   :  { %1638 = vmatpush3.xpose.msk.msra.mxu0 %vm808_vm2, %v753_v32 }
 0x139   :  { %1672 = vmatpush3.xpose.msk.msra.mxu1 %vm808_vm2, %v785_v33  ;;  %1639 = vmatprep.subr.msk.mxu0 %vm808_vm2, %v768_v34 }
 0x13a   :  { %1673 = vmatprep.subr.msk.mxu1 %vm808_vm2, %v800_v35 }
 0x13c   :  { %1640 = vmatpush3.xpose.msk.msra.mxu0 %vm808_vm2, %v752_v36 }
 0x13d   :  { %1674 = vmatpush3.xpose.msk.msra.mxu1 %vm808_vm2, %v784_v37  ;;  %1641 = vmatprep.subr.msk.mxu0 %vm808_vm2, %v767_v38 }
 0x13e   :  { %1675 = vmatprep.subr.msk.mxu1 %vm808_vm2, %v799_v39 }
 0x140   :  { %1642 = vmatpush3.xpose.msk.msra.mxu0 %vm808_vm2, %v751_v40 }
 0x141   :  { %1676 = vmatpush3.xpose.msk.msra.mxu1 %vm808_vm2, %v783_v41  ;;  %1643 = vmatprep.subr.msk.mxu0 %vm808_vm2, %v766_v42 }
 0x142   :  { %1677 = vmatprep.subr.msk.mxu1 %vm808_vm2, %v798_v43 }
 0x144   :  { %1644 = vmatpush3.xpose.msk.msra.mxu0 %vm808_vm2, %v750_v44 }
 0x145   :  { %1678 = vmatpush3.xpose.msk.msra.mxu1 %vm808_vm2, %v782_v45  ;;  %1645 = vmatprep.subr.msk.mxu0 %vm808_vm2, %v765_v46 }
 0x146   :  { %1679 = vmatprep.subr.msk.mxu1 %vm808_vm2, %v797_v47 }
 0x148   :  { %1646 = vmatpush3.xpose.msk.msra.mxu0 %vm808_vm2, %v749_v48 }
 0x149   :  { %1680 = vmatpush3.xpose.msk.msra.mxu1 %vm808_vm2, %v781_v49  ;;  %1647 = vmatprep.subr.msk.mxu0 %vm808_vm2, %v764_v50 }
 0x14a   :  { %1681 = vmatprep.subr.msk.mxu1 %vm808_vm2, %v796_v51 }
 0x14c   :  { %1648 = vmatpush3.xpose.msk.msra.mxu0 %vm808_vm2, %v748_v52 }
 0x14d   :  { %1682 = vmatpush3.xpose.msk.msra.mxu1 %vm808_vm2, %v780_v53  ;;  %1649 = vmatprep.subr.msk.mxu0 %vm808_vm2, %v763_v54 }
 0x14e   :  { %1683 = vmatprep.subr.msk.mxu1 %vm808_vm2, %v795_v55 }
 0x150   :  { %1650 = vmatpush3.xpose.msk.msra.mxu0 %vm808_vm2, %v747_v56 }
 0x151   :  { %1684 = vmatpush3.xpose.msk.msra.mxu1 %vm808_vm2, %v779_v57  ;;  %1651 = vmatprep.subr.msk.mxu0 %vm808_vm2, %v762_v59 }
 0x152   :  { %1685 = vmatprep.subr.msk.mxu1 %vm808_vm2, %v794_v60 }
 0x154   :  { %1652 = vmatpush3.xpose.msk.msra.mxu0 %vm808_vm2, %v746_v61 }
 0x155   :  { %1686 = vmatpush3.xpose.msk.msra.mxu1 %vm808_vm2, %v778_v62  ;;  %1653 = vmatprep.subr.msk.mxu0 %vm808_vm2, %v761_v63 }
 0x156   :  { %1687 = vmatprep.subr.msk.mxu1 %vm808_vm2, %v793_v0 }
 0x158   :  { %1654 = vmatpush3.xpose.msk.msra.mxu0 %vm808_vm2, %v745_v1 }
 0x159   :  { %1688 = vmatpush3.xpose.msk.msra.mxu1 %vm808_vm2, %v777_v2  ;;  %1655 = vmatprep.subr.msk.mxu0 %vm808_vm2, %v760_v3 }
 0x15a   :  { %1689 = vmatprep.subr.msk.mxu1 %vm808_vm2, %v792_v5 }
 0x15c   :  { %1656 = vmatpush3.xpose.msk.msra.mxu0 %vm808_vm2, %v744_v6 }
 0x15d   :  { %1690 = vmatpush3.xpose.msk.msra.mxu1 %vm808_vm2, %v776_v7 }
 0x15f   :  { %1658 = vmatmul.mubr.msk.f32.vlgmr.msra.gmra.mxu0 %vm808_vm2, %v2140_v16 }
 0x160   :  { %1692 = vmatmul.mubr.msk.f32.vlgmr.msra.gmra.mxu1 %vm808_vm2, %v2140_v16 }
 0x1de   :  { %v601_v9 = vpop.f32.mrf.mxu0 }
 0x1df   :  { %v678_v10 = vpop.f32.mrf.mxu1  ;;  %v602_v12 = vadd.f32 %v601_v9, %v521_v8 }
 0x1e0   :  { %v679_v13 = vadd.f32 %v678_v10, %v521_v8  ;;  %v603_v14 = vpop.f32.mrf.mxu0 }
 0x1e1   :  { %v680_v15 = vpop.f32.mrf.mxu1  ;;  %v1468_v18 = vmul.f32 -1.442695, %v602_v12  ;;  %v604_v19 = vadd.f32 %v603_v14, %v521_v8 }
 0x1e2   :  { %v1470_v11 = vmul.f32 -1.442695, %v679_v13  ;;  %v681_v20 = vadd.f32 %v680_v15, %v521_v8  ;;  %v607_v21 = vpop.f32.mrf.mxu0 }
 0x1e3   :  { %v684_v22 = vpop.f32.mrf.mxu1  ;;  %1698 = vpow2.f32 %v1468_v18  ;;  %v1469_v23 = vmul.f32 -1.442695, %v604_v19  ;;  %v608_v25 = vadd.f32 %v607_v21, %v526_v17 }
 0x1e4   :  { %v1471_v24 = vmul.f32 -1.442695, %v681_v20  ;;  %1700 = vpow2.f32 %v1470_v11  ;;  %v685_v16 = vadd.f32 %v684_v22, %v526_v17  ;;  %v609_v26 = vpop.f32.mrf.mxu0 }
 0x1e5   :  { %v686_v27 = vpop.f32.mrf.mxu1  ;;  %1702 = vpow2.f32 %v1469_v23  ;;  %v1472_v28 = vmul.f32 -1.442695, %v608_v25  ;;  %v610_v29 = vadd.f32 %v609_v26, %v526_v17 }
 0x1e6   :  { %v687_v30 = vadd.f32 %v686_v27, %v526_v17  ;;  %1704 = vpow2.f32 %v1471_v24  ;;  %v1474_v31 = vmul.f32 -1.442695, %v685_v16 }
 0x1e7   :  { %1706 = vpow2.f32 %v1472_v28  ;;  %v1473_v32 = vmul.f32 -1.442695, %v610_v29 }
 0x1e8   :  { %v1475_v33 = vmul.f32 -1.442695, %v687_v30  ;;  %1708 = vpow2.f32 %v1474_v31 }
 0x1e9   :  { %1710 = vpow2.f32 %v1473_v32 }
 0x1ea   :  { %1712 = vpow2.f32 %v1475_v33 }
 0x1f0   :  { %v1699_v34 = vpop.eup %1698 }
 0x1f1   :  { %v1701_v35 = vpop.eup %1700  ;;  %v713_v36 = vadd.f32 1.0, %v1699_v34 }
 0x1f2   :  { %v1703_v37 = vpop.eup %1702  ;;  %v715_v38 = vadd.f32 1.0, %v1701_v35 }
 0x1f3   :  { %v1705_v39 = vpop.eup %1704  ;;  %1714 = vrcp.f32 %v713_v36  ;;  %v714_v40 = vadd.f32 1.0, %v1703_v37 }
 0x1f4   :  { %v1707_v41 = vpop.eup %1706  ;;  %1716 = vrcp.f32 %v715_v38  ;;  %v716_v42 = vadd.f32 1.0, %v1705_v39 }
 0x1f5   :  { %v1709_v43 = vpop.eup %1708  ;;  %1718 = vrcp.f32 %v714_v40  ;;  %v717_v44 = vadd.f32 1.0, %v1707_v41 }
 0x1f6   :  { %v1711_v45 = vpop.eup %1710  ;;  %1720 = vrcp.f32 %v716_v42  ;;  %v719_v46 = vadd.f32 1.0, %v1709_v43 }
 0x1f7   :  { %v1713_v47 = vpop.eup %1712  ;;  %1722 = vrcp.f32 %v717_v44  ;;  %v718_v48 = vadd.f32 1.0, %v1711_v45 }
 0x1f8   :  { %1724 = vrcp.f32 %v719_v46  ;;  %v720_v49 = vadd.f32 1.0, %v1713_v47 }
 0x1f9   :  { %1726 = vrcp.f32 %v718_v48 }
 0x1fa   :  { %1728 = vrcp.f32 %v720_v49 }
 0x200   :  { %v2370_v50 = vpop.eup %1714 }
 0x201   :  { %v2372_v51 = vpop.eup %1716  ;;  %v1219_v52 = vrot.slane %v2370_v50, 3  ;;  %1312 = vst [vmem:[%s2461_s6] sm:$0xff] %v2370_v50 }
 0x202   :  { %v2379_v53 = vpop.eup %1718  ;;  %v1221_v54 = vrot.slane %v2372_v51, 3  ;;  %1314 = vst [vmem:[%s2461_s6 + $0x10] sm:$0xff] %v2372_v51 }
 0x203   :  { %v2386_v55 = vpop.eup %1720  ;;  %v1220_v56 = vrot.slane %v2379_v53, 3  ;;  %1313 = vst [vmem:[%s2461_s6 + $0x8] sm:$0xff] %v2379_v53  ;;  %v1227_v57 = vsel %vm1154_vm4, %v1219_v52, 0.0 }
 0x204   :  { %v1723_v59 = vpop.eup %1722  ;;  %v1222_v60 = vrot.slane %v2386_v55, 3  ;;  %1315 = vst [vmem:[%s2461_s6 + $0x18] sm:$0xff] %v2386_v55  ;;  %v1228_v61 = vrot.slane %v1227_v57, 4  ;;  %v1241_v62 = vsel %vm1154_vm4, %v1221_v54, 0.0 }
 0x205   :  { %v1725_v63 = vpop.eup %1724  ;;  %1316 = vst [vmem:[%s2461_s6 + $0x20] sm:$0x1] %v1723_v59  ;;  %v1234_v0 = vsel %vm1154_vm4, %v1220_v56, 0.0  ;;  %v1242_v1 = vrot.slane %v1241_v62, 4  ;;  %v1740_v59 = vmov 1966171168  }
 0x206   :  { %v1727_v2 = vpop.eup %1726  ;;  %1318 = vst [vmem:[%s2461_s6 + $0x30] sm:$0x1] %v1725_v63  ;;  %v1229_v3 = vadd.f32 %v1228_v61, %v1227_v57  ;;  %v1235_v5 = vrot.slane %v1234_v0, 4  ;;  %v1248_v6 = vsel %vm1154_vm4, %v1222_v60, 0.0  ;;  %v1327_v60 = vunpack.c.l.s4 %v1740_v59 }
 0x207   :  { %v1729_v7 = vpop.eup %1728  ;;  %1317 = vst [vmem:[%s2461_s6 + $0x28] sm:$0x1] %v1727_v2  ;;  %v1243_v8 = vadd.f32 %v1242_v1, %v1241_v62  ;;  %v1249_v9 = vrot.slane %v1248_v6, 4 }
 0x208   :  { %1319 = vst [vmem:[%s2461_s6 + $0x38] sm:$0x1] %v1729_v7  ;;  %v1230_v10 = vrot.slane %v1229_v3, 2  ;;  %v1236_v12 = vadd.f32 %v1235_v5, %v1234_v0 }
 0x209   :  { %v1244_v13 = vrot.slane %v1243_v8, 2  ;;  %v1250_v14 = vadd.f32 %v1249_v9, %v1248_v6 }
 0x20a   :  { %v1231_v15 = vadd.f32 %v1230_v10, %v1229_v3  ;;  %v1237_v17 = vrot.slane %v1236_v12, 2  ;;  %v1328_v10 = vunpack.c.0.s8 %v1327_v60 }
 0x20b   :  { %v1245_v18 = vadd.f32 %v1244_v13, %v1243_v8  ;;  %v1251_v11 = vrot.slane %v1250_v14, 2 }
 0x20c   :  { %v1232_v19 = vrot.slane %v1231_v15, 1  ;;  %v1238_v20 = vadd.f32 %v1237_v17, %v1236_v12 }
 0x20d   :  { %v1246_v21 = vrot.slane %v1245_v18, 1  ;;  %v1252_v22 = vadd.f32 %v1251_v11, %v1250_v14 }
 0x20e   :  { %v1233_v23 = vadd.f32 %v1232_v19, %v1231_v15  ;;  %v1239_v24 = vrot.slane %v1238_v20, 1 }
 0x20f   :  { %v1247_v25 = vadd.f32 %v1246_v21, %v1245_v18  ;;  %v1253_v16 = vrot.slane %v1252_v22, 1 }
 0x210   :  { %v1240_v26 = vadd.f32 %v1239_v24, %v1238_v20  ;;  %v1256_v27 = vmul.f32 0.33333334, %v1233_v23 }
 0x211   :  { %v1254_v28 = vadd.f32 %v1253_v16, %v1252_v22  ;;  %v1258_v29 = vmul.f32 0.33333334, %v1247_v25 }
 0x212   :  { %v1257_v30 = vmul.f32 0.33333334, %v1240_v26  ;;  %v1260_v31 = vsub.f32 %v2370_v50, %v1256_v27 }
 0x213   :  { %v1259_v32 = vmul.f32 0.33333334, %v1254_v28  ;;  %v1262_v33 = vsub.f32 %v2372_v51, %v1258_v29  ;;  %v2429_v28 = vsub.s32 %v1328_v10, %v2096_v4 }
 0x214   :  { %v1261_v34 = vsub.f32 %v2379_v53, %v1257_v30  ;;  %v1264_v35 = vand.u32 2147483647, %v1260_v31 }
 0x215   :  { %v1263_v36 = vsub.f32 %v2386_v55, %v1259_v32  ;;  %v1266_v37 = vand.u32 2147483647, %v1262_v33 }
 0x216   :  { %v1265_v38 = vand.u32 2147483647, %v1261_v34  ;;  %v1272_v39 = vrot.slane %v1264_v35, 3 }
 0x217   :  { %v1267_v40 = vand.u32 2147483647, %v1263_v36  ;;  %v1274_v41 = vrot.slane %v1266_v37, 3 }
 0x218   :  { %v1273_v42 = vrot.slane %v1265_v38, 3  ;;  %v1280_v43 = vsel %vm1154_vm4, %v1272_v39, 0.0 }
 0x219   :  { %v1275_v44 = vrot.slane %v1267_v40, 3  ;;  %v1281_v45 = vrot.slane %v1280_v43, 4  ;;  %v1294_v46 = vsel %vm1154_vm4, %v1274_v41, 0.0 }
 0x21a   :  { %v1287_v47 = vsel %vm1154_vm4, %v1273_v42, 0.0  ;;  %v1295_v48 = vrot.slane %v1294_v46, 4 }
 0x21b   :  { %v1282_v49 = vadd.f32 %v1281_v45, %v1280_v43  ;;  %v1288_v52 = vrot.slane %v1287_v47, 4  ;;  %v1301_v54 = vsel %vm1154_vm4, %v1275_v44, 0.0 }
 0x21c   :  { %v1296_v56 = vadd.f32 %v1295_v48, %v1294_v46  ;;  %v1302_v57 = vrot.slane %v1301_v54, 4 }
 0x21d   :  { %v1283_v61 = vrot.slane %v1282_v49, 2  ;;  %v1289_v62 = vadd.f32 %v1288_v52, %v1287_v47 }
 0x21e   :  { %v1297_v63 = vrot.slane %v1296_v56, 2  ;;  %v1303_v0 = vadd.f32 %v1302_v57, %v1301_v54 }
 0x21f   :  { %v1070_v1 = vpop.f32.mrf.mxu0  ;;  %v1284_v2 = vadd.f32 %v1283_v61, %v1282_v49  ;;  %v1290_v3 = vrot.slane %v1289_v62, 2 }
 0x220   :  { %v1141_v5 = vpop.f32.mrf.mxu1  ;;  %v1146_v6 = vsub.f32 %v1070_v1, %v2370_v50  ;;  %v1298_v7 = vadd.f32 %v1297_v63, %v1296_v56  ;;  %v1304_v8 = vrot.slane %v1303_v0, 2 }
 0x221   :  { %v1148_v9 = vsub.f32 %v1141_v5, %v2372_v51  ;;  %v1285_v12 = vrot.slane %v1284_v2, 1  ;;  %v1291_v13 = vadd.f32 %v1290_v3, %v1289_v62  ;;  %v1072_v14 = vpop.f32.mrf.mxu0 }
 0x222   :  { %v1143_v15 = vpop.f32.mrf.mxu1  ;;  %v1150_v17 = vmul.f32 %v1146_v6, %v1146_v6  ;;  %v1299_v18 = vrot.slane %v1298_v7, 1  ;;  %v1305_v11 = vadd.f32 %v1304_v8, %v1303_v0  ;;  %v1147_v22 = vsub.f32 %v1072_v14, %v2379_v53 }
 0x223   :  { %v1152_v19 = vmul.f32 %v1148_v9, %v1148_v9  ;;  %v1286_v20 = vadd.f32 %v1285_v12, %v1284_v2  ;;  %v1292_v21 = vrot.slane %v1291_v13, 1  ;;  %v1149_v23 = vsub.f32 %v1143_v15, %v2386_v55 }
 0x224   :  { %v1155_v50 = vsel %vm1154_vm4, %v1150_v17, 0.0  ;;  %v1300_v24 = vadd.f32 %v1299_v18, %v1298_v7  ;;  %v1306_v25 = vrot.slane %v1305_v11, 1  ;;  %v1151_v30 = vmul.f32 %v1147_v22, %v1147_v22 }
 0x225   :  { %v1169_v51 = vsel %vm1154_vm4, %v1152_v19, 0.0  ;;  %v1156_v16 = vrot.slane %v1155_v50, 4  ;;  %v1293_v26 = vadd.f32 %v1292_v21, %v1291_v13  ;;  %v1153_v31 = vmul.f32 %v1149_v23, %v1149_v23 }
 0x226   :  { %v1170_v27 = vrot.slane %v1169_v51, 4  ;;  %v1307_v29 = vadd.f32 %v1306_v25, %v1305_v11  ;;  %v1308_v33 = vmul.f32 0.1, %v1286_v20  ;;  %v1310_v55 = vmul.f32 0.1, %v1300_v24 }
 0x227   :  { %v1157_v32 = vadd.f32 %v1156_v16, %v1155_v50  ;;  %v1309_v53 = vmul.f32 0.1, %v1293_v26  ;;  %v1162_v36 = vsel %vm1154_vm4, %v1151_v30, 0.0  ;;  %v1176_v37 = vsel %vm1154_vm4, %v1153_v31, 0.0 }
 0x228   :  { %v1171_v34 = vadd.f32 %v1170_v27, %v1169_v51  ;;  %v1311_v35 = vmul.f32 0.1, %v1307_v29  ;;  %v1163_v41 = vrot.slane %v1162_v36, 4  ;;  %v1177_v4 = vrot.slane %v1176_v37, 4 }
 0x229   :  { %v1158_v38 = vrot.slane %v1157_v32, 2  ;;  %v1360_v39 = vcombine.low %v1308_v33, %v1309_v53 }
 0x22a   :  { %v1172_v40 = vrot.slane %v1171_v34, 2  ;;  %v1361_v42 = vcombine.low %v1310_v55, %v1311_v35  ;;  %v1164_v46 = vadd.f32 %v1163_v41, %v1162_v36  ;;  %v1178_v48 = vadd.f32 %v1177_v4, %v1176_v37 }
 0x22b   :  { %v1159_v43 = vadd.f32 %v1158_v38, %v1157_v32  ;;  %v1368_v44 = vrot.slane %v1360_v39, %v2429_v28 }
 0x22c   :  { %v1173_v45 = vadd.f32 %v1172_v40, %v1171_v34  ;;  %v1375_v47 = vrot.slane %v1361_v42, %v2429_v28  ;;  %v1165_v54 = vrot.slane %v1164_v46, 2  ;;  %v1179_v57 = vrot.slane %v1178_v48, 2 }
 0x22d   :  { %v1160_v49 = vrot.slane %v1159_v43, 1 }
 0x22e   :  { %v1174_v52 = vrot.slane %v1173_v45, 1  ;;  %v1376_v56 = vcombine.low %v1368_v44, %v1375_v47  ;;  %v1166_v62 = vadd.f32 %v1165_v54, %v1164_v46  ;;  %v1180_v0 = vadd.f32 %v1179_v57, %v1178_v48 }
 0x22f   :  { %v1161_v60 = vadd.f32 %v1160_v49, %v1159_v43 }
 0x230   :  { %v1175_v61 = vadd.f32 %v1174_v52, %v1173_v45  ;;  %v1383_v63 = vrot.slane %v1376_v56, %v2429_v28  ;;  %v1167_v3 = vrot.slane %v1166_v62, 1  ;;  %v1181_v5 = vrot.slane %v1180_v0, 1 }
 0x231   :  { %v1183_v1 = vadd.f32 0.001, %v1161_v60 }
 0x232   :  { %v1185_v2 = vadd.f32 0.001, %v1175_v61  ;;  %1544 = vst.msk [vmem:[%s2461_s6 + $0x22] ss:$8 sm:$0xf] %vm2436_vm5, %v1383_v63  ;;  %v1168_v58 = vadd.f32 %v1167_v3, %v1166_v62  ;;  %v1182_v6 = vadd.f32 %v1181_v5, %v1180_v0 }
 0x233   :  { %1730 = vrsqrt.f32 %v1183_v1  ;;  %vm1189_vm6 = vcmp.eq.f32.partialorder %v1183_v1, inf  ;;  %vm1191_vm7 = vcmp.eq.f32.partialorder %v1183_v1, 0.0  ;;  %v1192_v15 = vand.u32 2147483648, %v1183_v1 }
 0x234   :  { %1732 = vrsqrt.f32 %v1185_v2  ;;  %v1184_v7 = vadd.f32 0.001, %v1168_v58  ;;  %v1186_v8 = vadd.f32 0.001, %v1182_v6  ;;  %vm1203_vm8 = vcmp.eq.f32.partialorder %v1185_v2, inf }
 0x235   :  { %vm1205_vm9 = vcmp.eq.f32.partialorder %v1185_v2, 0.0  ;;  %v1206_v11 = vand.u32 2147483648, %v1185_v2 }
 0x236   :  { %1734 = vrsqrt.f32 %v1184_v7  ;;  %vm1196_vm10 = vcmp.eq.f32.partialorder %v1184_v7, inf  ;;  %v1199_v21 = vand.u32 2147483648, %v1184_v7  ;;  %vm1198_vm11 = vcmp.eq.f32.partialorder %v1184_v7, 0.0 }
 0x237   :  { %1736 = vrsqrt.f32 %v1186_v8  ;;  %vm1210_vm12 = vcmp.eq.f32.partialorder %v1186_v8, inf  ;;  %v1213_v50 = vand.u32 2147483648, %v1186_v8  ;;  %vm1212_vm13 = vcmp.eq.f32.partialorder %v1186_v8, 0.0 }
 0x240   :  { %v1731_v9 = vpop.eup %1730 }
 0x241   :  { %v1733_v10 = vpop.eup %1732  ;;  %v1188_v12 = vmul.f32 %v1731_v9, %v1183_v1 }
 0x242   :  { %v1202_v13 = vmul.f32 %v1733_v10, %v1185_v2 }
 0x243   :  { %v1735_v14 = vpop.eup %1734  ;;  %v1190_v18 = vsel %vm1189_vm6, %v1183_v1, %v1188_v12 }
 0x244   :  { %v1737_v17 = vpop.eup %1736  ;;  %v1195_v19 = vmul.f32 %v1735_v14, %v1184_v7  ;;  %v1204_v20 = vsel %vm1203_vm8, %v1185_v2, %v1202_v13  ;;  %v1193_v24 = vsel %vm1191_vm7, %v1192_v15, %v1190_v18 }
 0x245   :  { %v1209_v22 = vmul.f32 %v1737_v17, %v1186_v8  ;;  %v1207_v16 = vsel %vm1205_vm9, %v1206_v11, %v1204_v20 }
 0x246   :  { %v1197_v23 = vsel %vm1196_vm10, %v1184_v7, %v1195_v19 }
 0x247   :  { %v1200_v25 = vsel %vm1198_vm11, %v1199_v21, %v1197_v23  ;;  %v1211_v51 = vsel %vm1210_vm12, %v1186_v8, %v1209_v22 }
 0x248   :  { %v1324_v26 = vcombine.low %v1193_v24, %v1200_v25  ;;  %v1214_v27 = vsel %vm1212_vm13, %v1213_v50, %v1211_v51 }
 0x249   :  { %v1325_v29 = vcombine.low %v1207_v16, %v1214_v27 }
 0x24a   :  { %v1332_v30 = vrot.slane %v1324_v26, %v2429_v28 }
 0x24b   :  { %v1339_v31 = vrot.slane %v1325_v29, %v2429_v28 }
 0x24d   :  { %v1340_v32 = vcombine.low %v1332_v30, %v1339_v31 }
 0x24f   :  { %v1347_v33 = vrot.slane %v1340_v32, %v2429_v28 }
 0x251   :  { %1543 = vst.msk [vmem:[%s2461_s6 + $0x21] ss:$8 sm:$0xf] %vm2436_vm5, %v1347_v33 }

</bundles_post_ra>
